<compile_context>
chip_gen: v7x
topology: tpu7x:2x2x1
jax: 0.10.0
libtpu: 0.0.40
codegen_flags: <defaults>
</compile_context>

<pallas_src>
import jax
import jax.numpy as jnp
from jax.experimental import pallas as pl
from jax.experimental.pallas import tpu as pltpu

HIDDEN = 20
LANE = 128
SUBLANE = 8
TB_MAX = 2048          # batch rows per grid step (sweepable 2048-4096)
COMPUTE_DTYPE = jnp.bfloat16


def _round_up(n, m):
    return (n + m - 1) // m * m


# ---------------------------------------------------------------------------
# Kernel: one batch tile of the full MLP, single packed [mean | std] output.
# ---------------------------------------------------------------------------
def _policy_kernel(x_ref, w1_ref, b1_ref, w2_ref, b2_ref, wh_ref, bh_ref,
                   out_ref):
    x = x_ref[...]                                                   # (TB, S_pad) bf16

    h1 = jnp.dot(x, w1_ref[...], preferred_element_type=jnp.float32) + b1_ref[...]
    h1 = jnp.maximum(h1, 0.0).astype(w2_ref.dtype)                   # (TB, H_pad) bf16

    h2 = jnp.dot(h1, w2_ref[...], preferred_element_type=jnp.float32) + b2_ref[...]
    h2 = jnp.maximum(h2, 0.0).astype(wh_ref.dtype)                   # (TB, H_pad) bf16

    head = jnp.dot(h2, wh_ref[...], preferred_element_type=jnp.float32) + bh_ref[...]

    # Packed output: lanes [0, a_pad) = mean, lanes [a_pad, 2*a_pad) = exp(log_std).
    # Mask with an iota instead of slicing at a non-vreg boundary.
    a_pad = out_ref.shape[-1] // 2
    lane = jax.lax.broadcasted_iota(jnp.int32, head.shape, dimension=1)
    out_ref[...] = jnp.where(lane >= a_pad, jnp.exp(head), head).astype(out_ref.dtype)


# ---------------------------------------------------------------------------
# Host-side param packing (done once, not per call): pad + fuse heads + cast.
# Zero padding is exact: padded hidden columns stay 0 through ReLU, padded
# head rows/cols contribute nothing, and outputs are sliced back.
# ---------------------------------------------------------------------------
def pack_params(params, state_size, action_size, hidden=HIDDEN,
                compute_dtype=COMPUTE_DTYPE):
    w1, b1, w2, b2, wm, bm, ws, bs = params
    s_pad = _round_up(state_size, SUBLANE)
    h_pad = _round_up(hidden, LANE)
    a_pad = _round_up(action_size, LANE // 2)   # 64-lane granule per head

    def pad2(a, r, c):
        return jnp.pad(a, ((0, r - a.shape[0]), (0, c - a.shape[1])))

    w1p = pad2(w1, s_pad, h_pad).astype(compute_dtype)
    b1p = jnp.pad(b1, (0, h_pad - hidden)).reshape(1, h_pad).astype(jnp.float32)
    w2p = pad2(w2, h_pad, h_pad).astype(compute_dtype)
    b2p = jnp.pad(b2, (0, h_pad - hidden)).reshape(1, h_pad).astype(jnp.float32)
    whp = jnp.concatenate([pad2(wm, h_pad, a_pad), pad2(ws, h_pad, a_pad)],
                          axis=1).astype(compute_dtype)               # (H_pad, 2*a_pad)
    bhp = jnp.concatenate([jnp.pad(bm, (0, a_pad - action_size)),
                           jnp.pad(bs, (0, a_pad - action_size))]
                          ).reshape(1, 2 * a_pad).astype(jnp.float32)
    return (w1p, b1p, w2p, b2p, whp, bhp)


# ---------------------------------------------------------------------------
# Wrapper: pads/casts x, runs the batch-tiled pallas_call, slices outputs.
# ---------------------------------------------------------------------------
def policy_network_continuous(x, packed, action_size):
    w1p, b1p, w2p, b2p, whp, bhp = packed
    B, S = x.shape
    s_pad, h_pad = w1p.shape
    head_w = whp.shape[1]
    a_pad = head_w // 2

    # Batch tiling: pad only to a sublane multiple; derive the tile size from
    # the step count.  Keep >= 2 grid steps when the batch allows it so both
    # v7x TensorCores get work (harmless on v5e/v6e).
    b8 = _round_up(B, SUBLANE)
    n_steps = max(1, pl.cdiv(b8, TB_MAX))
    if b8 >= 2 * SUBLANE:
        n_steps = max(n_steps, 2)
    tb = _round_up(pl.cdiv(b8, n_steps), SUBLANE)
    b_pad = n_steps * tb

    xp = x
    if (b_pad, s_pad) != (B, S):
        xp = jnp.pad(xp, ((0, b_pad - B), (0, s_pad - S)))
    xp = xp.astype(w1p.dtype)

    flops = 2 * b_pad * (s_pad * h_pad + h_pad * h_pad + h_pad * head_w)
    bytes_accessed = (xp.size * xp.dtype.itemsize
                      + sum(a.size * a.dtype.itemsize for a in packed)
                      + 4 * b_pad * head_w)
    cost = pl.CostEstimate(flops=flops,
                           transcendentals=b_pad * head_w,
                           bytes_accessed=bytes_accessed)

    out = pl.pallas_call(
        _policy_kernel,
        out_shape=jax.ShapeDtypeStruct((b_pad, head_w), jnp.float32),
        grid=(n_steps,),
        in_specs=[
            pl.BlockSpec((tb, s_pad), lambda i: (i, 0)),         # x: batch-tiled
            pl.BlockSpec((s_pad, h_pad), lambda i: (0, 0)),      # W1: VMEM-resident
            pl.BlockSpec((1, h_pad), lambda i: (0, 0)),          # b1
            pl.BlockSpec((h_pad, h_pad), lambda i: (0, 0)),      # W2
            pl.BlockSpec((1, h_pad), lambda i: (0, 0)),          # b2
            pl.BlockSpec((h_pad, head_w), lambda i: (0, 0)),     # fused [Wm|Ws]
            pl.BlockSpec((1, head_w), lambda i: (0, 0)),         # fused [bm|bs]
        ],
        out_specs=pl.BlockSpec((tb, head_w), lambda i: (i, 0)),  # packed [mean|std]
        compiler_params=pltpu.CompilerParams(
            dimension_semantics=("parallel",)),                  # shards batch on v7x
        cost_estimate=cost,
    )(xp, w1p, b1p, w2p, b2p, whp, bhp)

    mean = out[:B, :action_size]
    std = out[:B, a_pad:a_pad + action_size]
    return mean, std


# ---------------------------------------------------------------------------
# Deterministic PyTorch-Linear-style init (raw, unpadded f32 params).
# ---------------------------------------------------------------------------
def init_params(key, state_size, action_size, hidden=HIDDEN):
    def linear(k, fan_in, fan_out):
        kw, kb = jax.random.split(k)
        bound = 1.0 / jnp.sqrt(float(fan_in))
        w = jax.random.uniform(kw, (fan_in, fan_out), jnp.float32, -bound, bound)
        b = jax.random.uniform(kb, (fan_out,), jnp.float32, -bound, bound)
        return w, b

    k1, k2, k3, k4 = jax.random.split(key, 4)
    w1, b1 = linear(k1, state_size, hidden)
    w2, b2 = linear(k2, hidden, hidden)
    wm, bm = linear(k3, hidden, action_size)
    ws, bs = linear(k4, hidden, action_size)
    return (w1, b1, w2, b2, wm, bm, ws, bs)


def _reference(x, params):
    w1, b1, w2, b2, wm, bm, ws, bs = params
    h1 = jnp.maximum(x @ w1 + b1, 0.0)
    h2 = jnp.maximum(h1 @ w2 + b2, 0.0)
    return h2 @ wm + bm, jnp.exp(h2 @ ws + bs)


if __name__ == "__main__":
    key = jax.random.PRNGKey(0)
    k_param, k_x = jax.random.split(key)

    batch, state_size, action_size = 2, 8, 4
    params = init_params(k_param, state_size, action_size)
    packed = pack_params(params, state_size, action_size)
    x = jax.random.normal(k_x, (batch, state_size), jnp.float32)

    mean, std = policy_network_continuous(x, packed, action_size)
    jax.block_until_ready((mean, std))

    ref_mean, ref_std = _reference(x, params)
    assert mean.shape == (batch, action_size) and std.shape == (batch, action_size)
    # bf16 matmul inputs (f32 accumulation) -> loosened tolerance vs f32 reference.
    assert jnp.allclose(mean, ref_mean, atol=5e-2, rtol=5e-2)
    assert jnp.allclose(std, ref_std, atol=5e-2, rtol=5e-2)

    print("KERNEL_OK")
</pallas_src>

<mosaic_0001>
module attributes {stable_mosaic.version = 11 : i64} {
  func.func @_policy_kernel(%arg0: i32, %arg1: memref<8x8xbf16, #tpu.memory_space<vmem>>, %arg2: memref<8x128xbf16, #tpu.memory_space<vmem>>, %arg3: memref<1x128xf32, #tpu.memory_space<vmem>>, %arg4: memref<128x128xbf16, #tpu.memory_space<vmem>>, %arg5: memref<1x128xf32, #tpu.memory_space<vmem>>, %arg6: memref<128x128xbf16, #tpu.memory_space<vmem>>, %arg7: memref<1x128xf32, #tpu.memory_space<vmem>>, %arg8: memref<8x128xf32, #tpu.memory_space<vmem>>) attributes {dimension_semantics = [#tpu.dimension_semantics<parallel>], iteration_bounds = array<i64: 1>, scalar_prefetch = 0 : i64, scratch_operands = 0 : i64, tpu.core_type = #tpu.core_type<tc>, window_params = [{transform_indices = @transform_0, window_bounds = array<i64: 8, 8>}, {pipeline_mode = #tpu.pipeline_mode<synchronous>, transform_indices = @transform_1, window_bounds = array<i64: 8, 128>}, {pipeline_mode = #tpu.pipeline_mode<synchronous>, transform_indices = @transform_2, window_bounds = array<i64: 1, 128>}, {pipeline_mode = #tpu.pipeline_mode<synchronous>, transform_indices = @transform_3, window_bounds = array<i64: 128, 128>}, {pipeline_mode = #tpu.pipeline_mode<synchronous>, transform_indices = @transform_4, window_bounds = array<i64: 1, 128>}, {pipeline_mode = #tpu.pipeline_mode<synchronous>, transform_indices = @transform_5, window_bounds = array<i64: 128, 128>}, {pipeline_mode = #tpu.pipeline_mode<synchronous>, transform_indices = @transform_6, window_bounds = array<i64: 1, 128>}, {transform_indices = @transform_7, window_bounds = array<i64: 8, 128>}]} {
    %c0 = arith.constant 0 : index
    %c0_0 = arith.constant 0 : index
    %0 = vector.load %arg1[%c0, %c0_0] : memref<8x8xbf16, #tpu.memory_space<vmem>>, vector<8x8xbf16>
    %c0_1 = arith.constant 0 : index
    %c0_2 = arith.constant 0 : index
    %1 = vector.load %arg2[%c0_1, %c0_2] : memref<8x128xbf16, #tpu.memory_space<vmem>>, vector<8x128xbf16>
    %cst = arith.constant dense<0.000000e+00> : vector<8x128xf32>
    %2 = tpu.matmul %0, %1, %cst {dimension_numbers = #tpu.dot_dimension_numbers<[1], [0], [0], [1], [0, 0, 1, 1], [], []>} : vector<8x8xbf16>, vector<8x128xbf16>, vector<8x128xf32> -> vector<8x128xf32>
    %c0_3 = arith.constant 0 : index
    %c0_4 = arith.constant 0 : index
    %3 = vector.load %arg3[%c0_3, %c0_4] : memref<1x128xf32, #tpu.memory_space<vmem>>, vector<1x128xf32>
    %4 = vector.broadcast %3 : vector<1x128xf32> to vector<8x128xf32>
    %5 = arith.addf %2, %4 : vector<8x128xf32>
    %cst_5 = arith.constant 0.000000e+00 : f32
    %6 = vector.broadcast %cst_5 : f32 to vector<8x128xf32>
    %7 = arith.maximumf %5, %6 : vector<8x128xf32>
    %8 = arith.truncf %7 : vector<8x128xf32> to vector<8x128xbf16>
    %c0_6 = arith.constant 0 : index
    %c0_7 = arith.constant 0 : index
    %9 = vector.load %arg4[%c0_6, %c0_7] : memref<128x128xbf16, #tpu.memory_space<vmem>>, vector<128x128xbf16>
    %cst_8 = arith.constant dense<0.000000e+00> : vector<8x128xf32>
    %10 = tpu.matmul %8, %9, %cst_8 {dimension_numbers = #tpu.dot_dimension_numbers<[1], [0], [0], [1], [0, 0, 1, 1], [], []>} : vector<8x128xbf16>, vector<128x128xbf16>, vector<8x128xf32> -> vector<8x128xf32>
    %c0_9 = arith.constant 0 : index
    %c0_10 = arith.constant 0 : index
    %11 = vector.load %arg5[%c0_9, %c0_10] : memref<1x128xf32, #tpu.memory_space<vmem>>, vector<1x128xf32>
    %12 = vector.broadcast %11 : vector<1x128xf32> to vector<8x128xf32>
    %13 = arith.addf %10, %12 : vector<8x128xf32>
    %cst_11 = arith.constant 0.000000e+00 : f32
    %14 = vector.broadcast %cst_11 : f32 to vector<8x128xf32>
    %15 = arith.maximumf %13, %14 : vector<8x128xf32>
    %16 = arith.truncf %15 : vector<8x128xf32> to vector<8x128xbf16>
    %c0_12 = arith.constant 0 : index
    %c0_13 = arith.constant 0 : index
    %17 = vector.load %arg6[%c0_12, %c0_13] : memref<128x128xbf16, #tpu.memory_space<vmem>>, vector<128x128xbf16>
    %cst_14 = arith.constant dense<0.000000e+00> : vector<8x128xf32>
    %18 = tpu.matmul %16, %17, %cst_14 {dimension_numbers = #tpu.dot_dimension_numbers<[1], [0], [0], [1], [0, 0, 1, 1], [], []>} : vector<8x128xbf16>, vector<128x128xbf16>, vector<8x128xf32> -> vector<8x128xf32>
    %c0_15 = arith.constant 0 : index
    %c0_16 = arith.constant 0 : index
    %19 = vector.load %arg7[%c0_15, %c0_16] : memref<1x128xf32, #tpu.memory_space<vmem>>, vector<1x128xf32>
    %20 = vector.broadcast %19 : vector<1x128xf32> to vector<8x128xf32>
    %21 = arith.addf %18, %20 : vector<8x128xf32>
    %22 = tpu.iota {dimensions = array<i32: 1>} : vector<8x128xi32>
    %c64_i32 = arith.constant 64 : i32
    %23 = vector.broadcast %c64_i32 : i32 to vector<8x128xi32>
    %24 = arith.cmpi sge, %22, %23 : vector<8x128xi32>
    %25 = math.exp %21 : vector<8x128xf32>
    %26 = arith.select %24, %25, %21 : vector<8x128xi1>, vector<8x128xf32>
    %c0_17 = arith.constant 0 : index
    %c0_18 = arith.constant 0 : index
    %27 = vector.load %arg8[%c0_17, %c0_18] : memref<8x128xf32, #tpu.memory_space<vmem>>, vector<8x128xf32>
    tpu.vector_store %arg8[%c0_17, %c0_18], %26 {strides = array<i32>} : memref<8x128xf32, #tpu.memory_space<vmem>>, vector<8x128xf32>,
    return
  }
  func.func @transform_0(%arg0: i32) -> (i32, i32) {
    %c0_i32 = arith.constant 0 : i32
    %c0_i32_0 = arith.constant 0 : i32
    return %arg0, %c0_i32 : i32, i32
  }
  func.func @transform_1(%arg0: i32) -> (i32, i32) {
    %c0_i32 = arith.constant 0 : i32
    %c0_i32_0 = arith.constant 0 : i32
    %c0_i32_1 = arith.constant 0 : i32
    return %c0_i32, %c0_i32_0 : i32, i32
  }
  func.func @transform_2(%arg0: i32) -> (i32, i32) {
    %c0_i32 = arith.constant 0 : i32
    %c0_i32_0 = arith.constant 0 : i32
    %c0_i32_1 = arith.constant 0 : i32
    return %c0_i32, %c0_i32_0 : i32, i32
  }
  func.func @transform_3(%arg0: i32) -> (i32, i32) {
    %c0_i32 = arith.constant 0 : i32
    %c0_i32_0 = arith.constant 0 : i32
    %c0_i32_1 = arith.constant 0 : i32
    return %c0_i32, %c0_i32_0 : i32, i32
  }
  func.func @transform_4(%arg0: i32) -> (i32, i32) {
    %c0_i32 = arith.constant 0 : i32
    %c0_i32_0 = arith.constant 0 : i32
    %c0_i32_1 = arith.constant 0 : i32
    return %c0_i32, %c0_i32_0 : i32, i32
  }
  func.func @transform_5(%arg0: i32) -> (i32, i32) {
    %c0_i32 = arith.constant 0 : i32
    %c0_i32_0 = arith.constant 0 : i32
    %c0_i32_1 = arith.constant 0 : i32
    return %c0_i32, %c0_i32_0 : i32, i32
  }
  func.func @transform_6(%arg0: i32) -> (i32, i32) {
    %c0_i32 = arith.constant 0 : i32
    %c0_i32_0 = arith.constant 0 : i32
    %c0_i32_1 = arith.constant 0 : i32
    return %c0_i32, %c0_i32_0 : i32, i32
  }
  func.func @transform_7(%arg0: i32) -> (i32, i32) {
    %c0_i32 = arith.constant 0 : i32
    %c0_i32_0 = arith.constant 0 : i32
    return %arg0, %c0_i32 : i32, i32
  }
}

</mosaic_0001>

<bundles_post_ra>
// kernel: tpu_custom_call.1
= control target key start
LH: loop header
LB: loop body
LE: loop exit
PB: predicated region body
PF: predicated region fallthrough
CT: control target
= control target key end

     0   :  { %12 = vsyncpa [#allocation3], 0  ;;  %s758_s0 = inlined_call_operand.hbm [shape: bf16[8,8], index: 0, kind: input, shape index: {}]   ;;  %s759_s1 = inlined_call_operand.hbm [shape: bf16[8,128], index: 1, kind: input, shape index: {}]   ;;  %s760_s2 = inlined_call_operand.vmem [shape: f32[1,128], index: 2, kind: input, shape index: {}]   ;;  %s761_s3 = inlined_call_operand.hbm [shape: bf16[128,128], index: 3, kind: input, shape index: {}]   ;;  %s762_s4 = inlined_call_operand.vmem [shape: f32[1,128], index: 4, kind: input, shape index: {}]   ;;  %s763_s5 = inlined_call_operand.hbm [shape: bf16[128,128], index: 5, kind: input, shape index: {}]   ;;  %s764_s6 = inlined_call_operand.vmem [shape: f32[1,128], index: 6, kind: input, shape index: {}]   ;;  %s765_s7 = inlined_call_operand.hbm [shape: f32[8,128], index: 7, kind: output, shape index: {}]  }
   0x1   :  { %13 = vsyncpa [#allocation6], 0 }
   0x2   :  { %14 = vsyncpa [#allocation9], 0 }
   0x3   :  { %15 = vsyncpa [#allocation4], 0  ;;  %s617_s24 = smov [#allocation5]   ;;  %s618_s26 = smov [#allocation2]  }
   0x4   :  { %s32_s25 = sshll.u32 %s617_s24, 4  ;;  %s22_s27 = sshll.u32 %s618_s26, 4  ;;  %s33_s25 = int_to_ptr.vmem [resolvable:$true] %s32_s25  ;;  %s23_s27 = int_to_ptr.vmem [resolvable:$true] %s22_s27 }
   0x5   :  { %s499_s30 = scalar_lea.hbm %s759_s1, 64 }
   0x6   :  { %p500_p0 = scmp.ne.s32.totalorder %s759_s1, %s499_s30  ;;  %p503_p1 = scmp.lt.u32.totalorder %s499_s30, %s759_s1 }
   0x8   :  { %p505_p2 = pnand %p503_p1, %p500_p0 }
   0xa   :  { %508 = shalt.err (!%p505_p2)
}
   0xb   :  { %s509_s12 = scalar_lea.vmem %s33_s25, 64  ;;  %p514_p4 = scmp.lt.s32.totalorder %s33_s25, %s33_s25 }
   0xc   :  { %p510_p3 = scmp.ne.s32.totalorder %s33_s25, %s509_s12  ;;  %p515_p5 = scmp.lt.s32.totalorder %s509_s12, %s509_s12 }
   0xe   :  { %p516_p6 = por %p515_p5, %p514_p4 }
  0x10   :  { %p517_p7 = pnand %p516_p6, %p510_p3 }
  0x12   :  { %520 = shalt.err (!%p517_p7)
}
  0x13   :  { %35 = dma.hbm_to_vmem [thread:$0]  %s759_s1, 64, %s33_s25, [#allocation6]  }
  0x14   :  { %s521_s17 = scalar_lea.hbm %s758_s0, 64 }
  0x15   :  { %p522_p8 = scmp.ne.s32.totalorder %s758_s0, %s521_s17  ;;  %p525_p9 = scmp.lt.u32.totalorder %s521_s17, %s758_s0 }
  0x17   :  { %p527_p10 = pnand %p525_p9, %p522_p8 }
  0x19   :  { %530 = shalt.err (!%p527_p10)
}
  0x1a   :  { %s531_s22 = scalar_lea.vmem %s23_s27, 64  ;;  %p536_p12 = scmp.lt.s32.totalorder %s23_s27, %s23_s27 }
  0x1b   :  { %p532_p11 = scmp.ne.s32.totalorder %s23_s27, %s531_s22  ;;  %p537_p13 = scmp.lt.s32.totalorder %s531_s22, %s531_s22 }
  0x1d   :  { %p538_p0 = por %p537_p13, %p536_p12 }
  0x1f   :  { %p539_p1 = pnand %p538_p0, %p532_p11 }
  0x21   :  { %542 = shalt.err (!%p539_p1)
}
  0x22   :  { %25 = dma.hbm_to_vmem [thread:$0]  %s758_s0, 64, %s23_s27, [#allocation3]  }
  0x23   :  { %s619_s24 = smov [#allocation7]   ;;  %s543_s29 = scalar_lea.hbm %s761_s3, 1024 }
  0x24   :  { %s43_s25 = sshll.u32 %s619_s24, 4  ;;  %p544_p2 = scmp.ne.s32.totalorder %s761_s3, %s543_s29  ;;  %s44_s25 = int_to_ptr.vmem [resolvable:$true] %s43_s25 }
  0x25   :  { %p547_p3 = scmp.lt.u32.totalorder %s543_s29, %s761_s3 }
  0x27   :  { %p549_p4 = pnand %p547_p3, %p544_p2 }
  0x29   :  { %552 = shalt.err (!%p549_p4)
}
  0x2a   :  { %s553_s11 = scalar_lea.vmem %s44_s25, 1024  ;;  %p558_p6 = scmp.lt.s32.totalorder %s44_s25, %s44_s25 }
  0x2b   :  { %p554_p5 = scmp.ne.s32.totalorder %s44_s25, %s553_s11  ;;  %p559_p7 = scmp.lt.s32.totalorder %s553_s11, %s553_s11 }
  0x2d   :  { %p560_p8 = por %p559_p7, %p558_p6 }
  0x2f   :  { %p561_p9 = pnand %p560_p8, %p554_p5 }
  0x31   :  { %564 = shalt.err (!%p561_p9)
}
  0x32   :  { %s620_s0 = smov 64   ;;  %s621_s27 = smov 4  }
  0x33   :  { %49 = dma.hbm_to_vmem [thread:$0]  %s761_s3, 1024, %s44_s25, [#allocation6], %s620_s0, %s620_s0, %s621_s27  }
  0x34   :  { %s622_s14 = smov [#allocation8]   ;;  %s565_s18 = scalar_lea.hbm %s763_s5, 1024 }
  0x35   :  { %s57_s15 = sshll.u32 %s622_s14, 4  ;;  %p566_p10 = scmp.ne.s32.totalorder %s763_s5, %s565_s18  ;;  %s58_s15 = int_to_ptr.vmem [resolvable:$true] %s57_s15 }
  0x36   :  { %p569_p11 = scmp.lt.u32.totalorder %s565_s18, %s763_s5 }
  0x38   :  { %p571_p12 = pnand %p569_p11, %p566_p10 }
  0x3a   :  { %574 = shalt.err (!%p571_p12)
}
  0x3b   :  { %s575_s1 = scalar_lea.vmem %s58_s15, 1024  ;;  %p580_p0 = scmp.lt.s32.totalorder %s58_s15, %s58_s15 }
  0x3c   :  { %p576_p13 = scmp.ne.s32.totalorder %s58_s15, %s575_s1  ;;  %p581_p1 = scmp.lt.s32.totalorder %s575_s1, %s575_s1 }
  0x3e   :  { %p582_p2 = por %p581_p1, %p580_p0 }
  0x40   :  { %p583_p3 = pnand %p582_p2, %p576_p13 }
  0x42   :  { %586 = shalt.err (!%p583_p3)
}
  0x43   :  { %63 = dma.hbm_to_vmem [thread:$0]  %s763_s5, 1024, %s58_s15, [#allocation9], %s620_s0, %s620_s0, %s621_s27  }
  0x44   :  { %609 = dma.done.wait [#allocation3], 64  }
  0x45   :  { %610 = vsyncadd [#allocation3], 4294967232 }
  0x46   :  { %611 = dma.done.wait [#allocation6], 1088  }
  0x47   :  { %612 = vsyncadd [#allocation6], 4294966208 }
  0x48   :  { %613 = dma.done.wait [#allocation9], 1024  }
  0x49   :  { %614 = vsyncadd [#allocation9], 4294966272  ;;  %v623_v0 = vmov 0.0   ;;  %vm624_vm0 = vmmov 0   ;;  %vm92_vm1 = vcmask 1043456   ;;  %vm88_vm2 = vcmask 64512  }
  0x4a   :  { %426 = vmatprep.subr.bf16.mxu0 %v623_v0  ;;  %428 = vmatprep.mubr.msk.bf16.mxu0 %vm624_vm0, %v623_v0  ;;  %v80_v1 = vld [vmem:[#allocation5] sm:$0xf]  ;;  %v481_v3 = vld [vmem:[#allocation7] sm:$0xff]   ;;  %v79_v4 = vld [vmem:[#allocation2] sm:$0xf]  ;;  %v362_v43 = vlaneseq }
  0x4b   :  { %432 = vmatprep.subr.bf16.mxu1 %v623_v0  ;;  %448 = vmatprep.mubr.msk.bf16.mxu1 %vm624_vm0, %v623_v0  ;;  %v94_v2 = vsel %vm92_vm1, %v80_v1, 0  ;;  %v482_v5 = vld [vmem:[#allocation7 + $0x8] sm:$0xff]   ;;  %v483_v6 = vld [vmem:[#allocation7 + $0x10] sm:$0xff]   ;;  %v484_v7 = vld [vmem:[#allocation7 + $0x18] sm:$0xff]  }
  0x4c   :  { %427 = vmatpush3.bf16.msra.mxu0 %v94_v2  ;;  %433 = vmatpush3.bf16.msra.mxu1 %v481_v3  ;;  %v485_v8 = vld [vmem:[#allocation7 + $0x20] sm:$0xff]   ;;  %v486_v9 = vld [vmem:[#allocation7 + $0x28] sm:$0xff]   ;;  %v487_v10 = vld [vmem:[#allocation7 + $0x30] sm:$0xff]   ;;  %v363_v44 = vand.u32 127, %v362_v43 }
  0x4d   :  { %452 = vmatprep.subr.bf16.mxu0 %v623_v0  ;;  %434 = vmatprep.subr.bf16.mxu1 %v623_v0  ;;  %v488_v11 = vld [vmem:[#allocation7 + $0x38] sm:$0xff]   ;;  %v489_v12 = vld [vmem:[#allocation8] sm:$0xff]   ;;  %v490_v13 = vld [vmem:[#allocation8 + $0x8] sm:$0xff]  }
  0x4e   :  { %v491_v14 = vld [vmem:[#allocation8 + $0x10] sm:$0xff]   ;;  %v492_v15 = vld [vmem:[#allocation8 + $0x18] sm:$0xff]   ;;  %v493_v16 = vld [vmem:[#allocation8 + $0x20] sm:$0xff]   ;;  %vm364_vm3 = vcmp.ge.s32.totalorder %v363_v44, 64 }
  0x4f   :  { %429 = vmatmul.mubr.msk.bf16.vlgmr.msra.gmra.mrb[0].mxu0 %vm88_vm2, %v79_v4  ;;  %v494_v17 = vld [vmem:[#allocation8 + $0x28] sm:$0xff]   ;;  %v386_v18 = vld [vmem:[%s760_s2] ss:$0 sm:$0xff]  ;;  %v495_v26 = vld [vmem:[#allocation8 + $0x30] sm:$0xff]  }
  0x50   :  { %468 = vmatprep.mubr.msk.bf16.mxu0 %vm624_vm0, %v623_v0  ;;  %435 = vmatpush3.bf16.msra.mxu1 %v482_v5  ;;  %v496_v27 = vld [vmem:[#allocation8 + $0x38] sm:$0xff]  }
  0x51   :  { %436 = vmatprep.subr.bf16.mxu1 %v623_v0  ;;  %453 = vmatpush3.bf16.msra.mxu0 %v489_v12  ;;  %v388_v28 = vld [vmem:[%s762_s4] ss:$0 sm:$0xff]  ;;  %s625_s4 = smov [#allocation10]  }
  0x52   :  { %454 = vmatprep.subr.bf16.mxu0 %v623_v0  ;;  %v397_v36 = vld [vmem:[%s764_s6] ss:$0 sm:$0xff]  ;;  %s375_s29 = sshll.u32 %s625_s4, 4  ;;  %s376_s29 = int_to_ptr.vmem [resolvable:$true] %s375_s29 }
  0x53   :  { %s587_s30 = scalar_lea.vmem %s376_s29, 128  ;;  %p592_p5 = scmp.lt.s32.totalorder %s376_s29, %s376_s29 }
  0x54   :  { %437 = vmatpush3.bf16.msra.mxu1 %v483_v6  ;;  %p588_p4 = scmp.ne.s32.totalorder %s376_s29, %s587_s30  ;;  %p593_p6 = scmp.lt.s32.totalorder %s587_s30, %s587_s30 }
  0x55   :  { %438 = vmatprep.subr.bf16.mxu1 %v623_v0  ;;  %455 = vmatpush3.bf16.msra.mxu0 %v490_v13 }
  0x56   :  { %456 = vmatprep.subr.bf16.mxu0 %v623_v0  ;;  %p594_p7 = por %p593_p6, %p592_p5 }
  0x58   :  { %439 = vmatpush3.bf16.msra.mxu1 %v484_v7  ;;  %p595_p8 = pnand %p594_p7, %p588_p4 }
  0x59   :  { %440 = vmatprep.subr.bf16.mxu1 %v623_v0  ;;  %457 = vmatpush3.bf16.msra.mxu0 %v491_v14 }
  0x5a   :  { %458 = vmatprep.subr.bf16.mxu0 %v623_v0 }
  0x5c   :  { %441 = vmatpush3.bf16.msra.mxu1 %v485_v8 }
  0x5d   :  { %442 = vmatprep.subr.bf16.mxu1 %v623_v0  ;;  %459 = vmatpush3.bf16.msra.mxu0 %v492_v15 }
  0x5e   :  { %460 = vmatprep.subr.bf16.mxu0 %v623_v0 }
  0x60   :  { %443 = vmatpush3.bf16.msra.mxu1 %v486_v9 }
  0x61   :  { %444 = vmatprep.subr.bf16.mxu1 %v623_v0  ;;  %461 = vmatpush3.bf16.msra.mxu0 %v493_v16 }
  0x62   :  { %462 = vmatprep.subr.bf16.mxu0 %v623_v0 }
  0x64   :  { %445 = vmatpush3.bf16.msra.mxu1 %v487_v10 }
  0x65   :  { %446 = vmatprep.subr.bf16.mxu1 %v623_v0  ;;  %463 = vmatpush3.bf16.msra.mxu0 %v494_v17 }
  0x66   :  { %464 = vmatprep.subr.bf16.mxu0 %v623_v0 }
  0x68   :  { %447 = vmatpush3.bf16.msra.mxu1 %v488_v11 }
  0x69   :  { %465 = vmatpush3.bf16.msra.mxu0 %v495_v26 }
  0x6a   :  { %466 = vmatprep.subr.bf16.mxu0 %v623_v0 }
  0x6d   :  { %467 = vmatpush3.bf16.msra.mxu0 %v496_v27 }
 0x122   :  { %v130_v19 = vpop.f32.mrb[0].mxu0 }
 0x123   :  { %v131_v20 = vadd.f32 %v386_v18, %v130_v19  ;;  %v430_v21 = vpop.f32.mrb[1].mxu0 }
 0x124   :  { %v133_v22 = vpop.f32.mrb[2].mxu0 }
 0x125   :  { %v136_v23 = vmax.f32 %v131_v20, 0.0  ;;  %v431_v24 = vpop.f32.mrb[3].mxu0 }
 0x127   :  { %v137_v25 = vpack.c.bf16 %v136_v23, %v136_v23 }
 0x129   :  { %449 = vmatmul.mubr.bf16.vlgmr.msra.gmra.mrb[0].mxu1 %v137_v25 }
 0x1fc   :  { %v243_v29 = vpop.f32.mrb[0].mxu1 }
 0x1fd   :  { %v244_v30 = vadd.f32 %v388_v28, %v243_v29  ;;  %v450_v31 = vpop.f32.mrb[1].mxu1 }
 0x1fe   :  { %v246_v32 = vpop.f32.mrb[2].mxu1 }
 0x1ff   :  { %v249_v33 = vmax.f32 %v244_v30, 0.0  ;;  %v451_v34 = vpop.f32.mrb[3].mxu1 }
 0x201   :  { %v250_v35 = vpack.c.bf16 %v249_v33, %v249_v33 }
 0x203   :  { %469 = vmatmul.mubr.bf16.vlgmr.msra.gmra.mrb[4].mxu0 %v250_v35 }
 0x2d6   :  { %v356_v37 = vpop.f32.mrb[4].mxu0 }
 0x2d7   :  { %v357_v38 = vadd.f32 %v397_v36, %v356_v37  ;;  %v470_v39 = vpop.f32.mrb[5].mxu0 }
 0x2d8   :  { %v359_v40 = vpop.f32.mrb[6].mxu0 }
 0x2d9   :  { %v365_v41 = vmul.f32 1.442695, %v357_v38  ;;  %v471_v42 = vpop.f32.mrb[7].mxu0 }
 0x2db   :  { %497 = vpow2.f32 %v365_v41 }
 0x2e5   :  { %v498_v45 = vpop.eup %497 }
 0x2e6   :  { %v367_v46 = vsel %vm364_vm3, %v498_v45, %v357_v38 }
 0x2e7   :  { %368 = vst [vmem:[#allocation10] sm:$0xff] %v367_v46 }
 0x2e8   :  { %598 = shalt.err (!%p595_p8)
}
 0x2e9   :  { %s599_s9 = scalar_lea.hbm %s765_s7, 128 }
 0x2ea   :  { %p600_p9 = scmp.ne.s32.totalorder %s765_s7, %s599_s9  ;;  %p603_p10 = scmp.lt.u32.totalorder %s599_s9, %s765_s7 }
 0x2ec   :  { %p605_p11 = pnand %p603_p10, %p600_p9 }
 0x2ee   :  { %608 = shalt.err (!%p605_p11)
}
 0x2ef   :  { %378 = dma.vmem_to_hbm [thread:$0]  %s376_s29, 128, %s765_s7, [#allocation4]  }
 0x2f0   :  { %615 = dma.done.wait [#allocation4], 128  }
 0x2f1   :  { %616 = vsyncadd [#allocation4], 4294967168 }
 0x2f2   :  { %382 = vsyncpa [#allocation3], 1 }
 0x2f3   :  { %383 = vsyncpa [#allocation6], 1 }
 0x2f4   :  { %384 = vsyncpa [#allocation9], 1 }
 0x2f5   :  { %385 = vsyncpa [#allocation4], 1 }

</bundles_post_ra>
